<compile_context>
chip_gen: v6e
topology: v6e:2x2x1
jax: 0.10.0
libtpu: 0.0.40
codegen_flags: <defaults>
</compile_context>

<pallas_src>
import functools

import jax
import jax.numpy as jnp
from jax.experimental import pallas as pl
from jax.experimental.pallas import tpu as pltpu

EPS = 1e-6
_TILE_BUDGET_BYTES = 4 * 1024 * 1024      # ~4 MiB per buffered tile
_VMEM_LIMIT_BYTES = 48 * 1024 * 1024      # > default scoped on v5e/v6e/v7x, < v7x physical


def _compiler_params():
    return pltpu.CompilerParams(
        dimension_semantics=("parallel",),
        vmem_limit_bytes=_VMEM_LIMIT_BYTES,
    )


# ------------------------- tiling helper -------------------------

def _row_tile(n_rows, width, dtype, budget_bytes=_TILE_BUDGET_BYTES):
    """Row-tile size: dtype-aligned sublane multiple, sized only by the byte
    budget (no hard row cap), split into >=2 grid steps when possible so both
    v7x TensorCores get work."""
    itemsize = jnp.dtype(dtype).itemsize
    row_mult = {4: 8, 2: 16, 1: 32}.get(itemsize, 8)
    max_rows = max(row_mult, budget_bytes // max(1, width * itemsize))
    tile = max(row_mult, (max_rows // row_mult) * row_mult)
    if tile < n_rows:
        return tile
    # Budget covers the whole slab: still keep >=2 steps if the slab is big
    # enough, so ("parallel",) shards rows across the two TCs on v7x.
    if n_rows >= 2 * row_mult:
        half = ((n_rows + 1) // 2 + row_mult - 1) // row_mult * row_mult
        if half < n_rows:
            return half
    return n_rows  # full-extent block is always legal


# ------------------------- Pallas kernels -------------------------

def _ln_rows_kernel(x_ref, g_ref, b_ref, o_ref):
    """One logical row per block row (used when D >= 128 or not packable)."""
    x = x_ref[...].astype(jnp.float32)                       # (tr, D)
    d = x.shape[-1]
    mean = jnp.sum(x, axis=-1, keepdims=True) * (1.0 / d)
    xc = x - mean                                            # two-pass moments
    var = jnp.sum(xc * xc, axis=-1, keepdims=True) * (1.0 / (d - 1))
    inv = pl.reciprocal(jnp.sqrt(var) + EPS, approx=True)    # EUP slot
    y = xc * (g_ref[...].astype(jnp.float32) * inv) + b_ref[...].astype(jnp.float32)
    o_ref[...] = y.astype(o_ref.dtype)


def _ln_packed_kernel(x_ref, g_ref, b_ref, o_ref, *, pack, d):
    """`pack` = 128 // D logical rows per 128-wide block row (lane-dense)."""
    x = x_ref[...].astype(jnp.float32)                       # (tr, pack*d)
    tr = x.shape[0]
    xr = x.reshape(tr, pack, d)
    mean = jnp.sum(xr, axis=-1, keepdims=True) * (1.0 / d)
    xc = xr - mean                                           # two-pass moments
    var = jnp.sum(xc * xc, axis=-1, keepdims=True) * (1.0 / (d - 1))
    inv = pl.reciprocal(jnp.sqrt(var) + EPS, approx=True)    # EUP slot
    y = (xc * inv).reshape(tr, pack * d)
    y = y * g_ref[...].astype(jnp.float32) + b_ref[...].astype(jnp.float32)
    o_ref[...] = y.astype(o_ref.dtype)                       # unmasked vst


def _add_kernel(x_ref, y_ref, o_ref):
    """x + dropout(y); dropout is identity in eval mode."""
    o_ref[...] = x_ref[...] + y_ref[...]


# ------------------------- wrappers -------------------------

def layernorm_pallas(x2d, gamma, beta):
    R, D = x2d.shape
    assert D > 1, "unbiased std needs D > 1"

    pack = 128 // D if (D < 128 and 128 % D == 0) else 1
    if pack > 1 and R % pack == 0:
        rows, width = R // pack, pack * D
        xv = x2d.reshape(rows, width)
        g = jnp.tile(gamma.reshape(1, D), (1, pack))
        b = jnp.tile(beta.reshape(1, D), (1, pack))
        kernel = functools.partial(_ln_packed_kernel, pack=pack, d=D)
    else:
        rows, width = R, D
        xv = x2d
        g = gamma.reshape(1, D)
        b = beta.reshape(1, D)
        kernel = _ln_rows_kernel

    tr = _row_tile(rows, width, x2d.dtype)
    out = pl.pallas_call(
        kernel,
        out_shape=jax.ShapeDtypeStruct((rows, width), x2d.dtype),
        grid=(pl.cdiv(rows, tr),),
        in_specs=[
            pl.BlockSpec((tr, width), lambda i: (i, 0)),
            pl.BlockSpec((1, width), lambda i: (0, 0)),
            pl.BlockSpec((1, width), lambda i: (0, 0)),
        ],
        out_specs=pl.BlockSpec((tr, width), lambda i: (i, 0)),
        compiler_params=_compiler_params(),
    )(xv, g, b)
    return out.reshape(R, D)


def residual_add_pallas(x2d, y2d):
    # NOTE: under jit a plain `x + y` lets XLA fuse the add into the sublayer
    # epilogue and skips one HBM round trip; the Pallas path is kept here
    # (lane-dense) so the kernel is exercised end-to-end.
    R, D = x2d.shape
    n = R * D
    width = next((w for w in (4096, 2048, 1024, 512, 256, 128) if n % w == 0), D)
    rows = n // width
    xv = x2d.reshape(rows, width)
    yv = y2d.reshape(rows, width)

    tr = _row_tile(rows, width, x2d.dtype)
    out = pl.pallas_call(
        _add_kernel,
        out_shape=jax.ShapeDtypeStruct((rows, width), x2d.dtype),
        grid=(pl.cdiv(rows, tr),),
        in_specs=[
            pl.BlockSpec((tr, width), lambda i: (i, 0)),
            pl.BlockSpec((tr, width), lambda i: (i, 0)),
        ],
        out_specs=pl.BlockSpec((tr, width), lambda i: (i, 0)),
        compiler_params=_compiler_params(),
    )(xv, yv)
    return out.reshape(R, D)


def sublayer_connection(x, sublayer, gamma, beta):
    """Pallas port of SublayerConnection.forward(x, sublayer) (eval mode)."""
    B, S, D = x.shape
    x2d = x.reshape(B * S, D)

    normed = layernorm_pallas(x2d, gamma, beta).reshape(B, S, D)
    sub_out = sublayer(normed)

    if isinstance(sub_out, tuple):
        y = sub_out[0].reshape(B * S, D)
        out = residual_add_pallas(x2d, y).reshape(B, S, D)
        return (out,) + tuple(sub_out[1:])

    y = sub_out.reshape(B * S, D)
    return residual_add_pallas(x2d, y).reshape(B, S, D)


# ------------------------- reference (pure JAX) -------------------------

def _reference(x, sublayer, gamma, beta):
    mean = jnp.mean(x, axis=-1, keepdims=True)
    std = jnp.std(x, axis=-1, keepdims=True, ddof=1)   # torch unbiased std
    normed = gamma * (x - mean) / (std + EPS) + beta
    y = sublayer(normed)
    if isinstance(y, tuple):
        return (x + y[0],) + tuple(y[1:])
    return x + y


# ------------------------- demo -------------------------

if __name__ == "__main__":
    B, S, D = 2, 8, 32  # size = D = 32

    key = jax.random.PRNGKey(0)
    kx, kw, kb = jax.random.split(key, 3)

    x = jax.random.normal(kx, (B, S, D), dtype=jnp.float32)

    # LayerNorm parameters (nn.Parameter defaults: ones / zeros)
    gamma = jnp.ones((D,), dtype=jnp.float32)   # a_2
    beta = jnp.zeros((D,), dtype=jnp.float32)   # b_2

    # Example sublayer: deterministic linear projection (glue, plain JAX).
    W = jax.random.normal(kw, (D, D), dtype=jnp.float32) * 0.02
    bvec = jax.random.normal(kb, (D,), dtype=jnp.float32) * 0.02
    sublayer = lambda h: jnp.dot(h, W) + bvec

    out = sublayer_connection(x, sublayer, gamma, beta)
    out = jax.block_until_ready(out)

    ref = _reference(x, sublayer, gamma, beta)
    assert out.shape == (B, S, D)
    # Tolerance accounts for the approximate EUP reciprocal (rel err ~1e-4).
    assert jnp.allclose(out, ref, atol=5e-3, rtol=5e-3), "mismatch vs reference"

    # Also exercise the tuple-returning sublayer path.
    sublayer_tuple = lambda h: (jnp.dot(h, W) + bvec, jnp.float32(1.0))
    out_t = sublayer_connection(x, sublayer_tuple, gamma, beta)
    jax.block_until_ready(out_t[0])
    ref_t = _reference(x, sublayer_tuple, gamma, beta)
    assert jnp.allclose(out_t[0], ref_t[0], atol=5e-3, rtol=5e-3)

    print("KERNEL_OK")
</pallas_src>

<mosaic_0001>
module attributes {stable_mosaic.version = 11 : i64} {
  func.func @_ln_packed_kernel(%arg0: i32, %arg1: memref<4x128xf32, #tpu.memory_space<vmem>>, %arg2: memref<1x128xf32, #tpu.memory_space<vmem>>, %arg3: memref<1x128xf32, #tpu.memory_space<vmem>>, %arg4: memref<4x128xf32, #tpu.memory_space<vmem>>) attributes {dimension_semantics = [#tpu.dimension_semantics<parallel>], iteration_bounds = array<i64: 1>, scalar_prefetch = 0 : i64, scratch_operands = 0 : i64, tpu.core_type = #tpu.core_type<tc>, window_params = [{transform_indices = @transform_0, window_bounds = array<i64: 4, 128>}, {pipeline_mode = #tpu.pipeline_mode<synchronous>, transform_indices = @transform_1, window_bounds = array<i64: 1, 128>}, {pipeline_mode = #tpu.pipeline_mode<synchronous>, transform_indices = @transform_2, window_bounds = array<i64: 1, 128>}, {transform_indices = @transform_3, window_bounds = array<i64: 4, 128>}]} {
    %c0 = arith.constant 0 : index
    %c0_0 = arith.constant 0 : index
    %0 = vector.load %arg1[%c0, %c0_0] : memref<4x128xf32, #tpu.memory_space<vmem>>, vector<4x128xf32>
    %1 = vector.shape_cast %0 : vector<4x128xf32> to vector<4x4x32xf32>
    %cst = arith.constant dense<0.000000e+00> : vector<4x4xf32>
    %2 = vector.multi_reduction <add>, %1, %cst [2] : vector<4x4x32xf32> to vector<4x4xf32>
    %3 = vector.shape_cast %2 : vector<4x4xf32> to vector<4x4x1xf32>
    %cst_1 = arith.constant 3.125000e-02 : f32
    %4 = vector.broadcast %cst_1 : f32 to vector<4x4x1xf32>
    %5 = arith.mulf %3, %4 : vector<4x4x1xf32>
    %6 = vector.broadcast %5 : vector<4x4x1xf32> to vector<4x4x32xf32>
    %7 = arith.subf %1, %6 : vector<4x4x32xf32>
    %8 = arith.mulf %7, %7 : vector<4x4x32xf32>
    %cst_2 = arith.constant dense<0.000000e+00> : vector<4x4xf32>
    %9 = vector.multi_reduction <add>, %8, %cst_2 [2] : vector<4x4x32xf32> to vector<4x4xf32>
    %10 = vector.shape_cast %9 : vector<4x4xf32> to vector<4x4x1xf32>
    %cst_3 = arith.constant 0.0322580636 : f32
    %11 = vector.broadcast %cst_3 : f32 to vector<4x4x1xf32>
    %12 = arith.mulf %10, %11 : vector<4x4x1xf32>
    %13 = math.sqrt %12 : vector<4x4x1xf32>
    %cst_4 = arith.constant 9.99999997E-7 : f32
    %14 = vector.broadcast %cst_4 : f32 to vector<4x4x1xf32>
    %15 = arith.addf %13, %14 : vector<4x4x1xf32>
    %16 = tpu.reciprocal %15 {approx = true} : vector<4x4x1xf32> -> vector<4x4x1xf32>
    %17 = vector.broadcast %16 : vector<4x4x1xf32> to vector<4x4x32xf32>
    %18 = arith.mulf %7, %17 : vector<4x4x32xf32>
    %19 = vector.shape_cast %18 : vector<4x4x32xf32> to vector<4x128xf32>
    %c0_5 = arith.constant 0 : index
    %c0_6 = arith.constant 0 : index
    %20 = vector.load %arg2[%c0_5, %c0_6] : memref<1x128xf32, #tpu.memory_space<vmem>>, vector<1x128xf32>
    %21 = vector.broadcast %20 : vector<1x128xf32> to vector<4x128xf32>
    %22 = arith.mulf %19, %21 : vector<4x128xf32>
    %c0_7 = arith.constant 0 : index
    %c0_8 = arith.constant 0 : index
    %23 = vector.load %arg3[%c0_7, %c0_8] : memref<1x128xf32, #tpu.memory_space<vmem>>, vector<1x128xf32>
    %24 = vector.broadcast %23 : vector<1x128xf32> to vector<4x128xf32>
    %25 = arith.addf %22, %24 : vector<4x128xf32>
    %c0_9 = arith.constant 0 : index
    %c0_10 = arith.constant 0 : index
    %26 = vector.load %arg4[%c0_9, %c0_10] : memref<4x128xf32, #tpu.memory_space<vmem>>, vector<4x128xf32>
    tpu.vector_store %arg4[%c0_9, %c0_10], %25 {strides = array<i32>} : memref<4x128xf32, #tpu.memory_space<vmem>>, vector<4x128xf32>,
    return
  }
  func.func @transform_0(%arg0: i32) -> (i32, i32) {
    %c0_i32 = arith.constant 0 : i32
    %c0_i32_0 = arith.constant 0 : i32
    return %arg0, %c0_i32 : i32, i32
  }
  func.func @transform_1(%arg0: i32) -> (i32, i32) {
    %c0_i32 = arith.constant 0 : i32
    %c0_i32_0 = arith.constant 0 : i32
    %c0_i32_1 = arith.constant 0 : i32
    return %c0_i32, %c0_i32_0 : i32, i32
  }
  func.func @transform_2(%arg0: i32) -> (i32, i32) {
    %c0_i32 = arith.constant 0 : i32
    %c0_i32_0 = arith.constant 0 : i32
    %c0_i32_1 = arith.constant 0 : i32
    return %c0_i32, %c0_i32_0 : i32, i32
  }
  func.func @transform_3(%arg0: i32) -> (i32, i32) {
    %c0_i32 = arith.constant 0 : i32
    %c0_i32_0 = arith.constant 0 : i32
    return %arg0, %c0_i32 : i32, i32
  }
}

</mosaic_0001>

<bundles_post_ra>
// kernel: tpu_custom_call.1
= control target key start
LH: loop header
LB: loop body
LE: loop exit
PB: predicated region body
PF: predicated region fallthrough
CT: control target
= control target key end

     0   :  { %8 = vsyncpa [#allocation3], 0  ;;  %s397_s0 = inlined_call_operand.hbm [shape: f32[4,128], index: 0, kind: input, shape index: {}]   ;;  %s398_s1 = inlined_call_operand.vmem [shape: f32[1,128], index: 1, kind: input, shape index: {}]   ;;  %s399_s2 = inlined_call_operand.vmem [shape: f32[1,128], index: 2, kind: input, shape index: {}]   ;;  %s400_s3 = inlined_call_operand.hbm [shape: f32[4,128], index: 3, kind: output, shape index: {}]  }
   0x1   :  { %9 = vsyncpa [#allocation4], 0  ;;  %s307_s12 = smov [#allocation2]  }
   0x2   :  { %s16_s13 = sshll.u32 %s307_s12, 4  ;;  %s17_s13 = int_to_ptr.vmem [resolvable:$true] %s16_s13 }
   0x3   :  { %s271_s14 = scalar_lea.vmem %s17_s13, 64  ;;  %p276_p1 = scmp.lt.s32.totalorder %s17_s13, %s17_s13 }
   0x4   :  { %p272_p0 = scmp.ne.s32.totalorder %s17_s13, %s271_s14  ;;  %p277_p2 = scmp.lt.s32.totalorder %s271_s14, %s271_s14 }
   0x6   :  { %p278_p3 = por %p277_p2, %p276_p1 }
   0x8   :  { %p279_p4 = pnand %p278_p3, %p272_p0 }
   0xa   :  { %282 = shalt.err (!%p279_p4)
}
   0xb   :  { %19 = dma.hbm_to_vmem [thread:$0]  %s397_s0, 64, %s17_s13, [#allocation3]  }
   0xc   :  { %303 = dma.done.wait [#allocation3], 64  }
   0xd   :  { %304 = vsyncadd [#allocation3], 4294967232  ;;  %v27_v0 = vld [vmem:[#allocation2] sm:$0xf]  ;;  %s308_s17 = smov 32   ;;  %s309_s18 = smov 96   ;;  %v42_v3 = vlaneseq }
   0xe   :  { %35 = vrot.lane.b32.xlu1 %v27_v0, %s308_s17  ;;  %29 = vrot.lane.b32.xlu0 %v27_v0, %s309_s18  ;;  %s310_s19 = smov 64   ;;  %v311_v1 = vmov 1983009808   ;;  %v312_v6 = vmov 1934713408   ;;  %vm72_vm0 = vcmask 257024  }
   0xf   :  { %v40_v2 = vunpack.c.l.s4 %v311_v1  ;;  %v43_v5 = vshrl.u32 %v42_v3, 7  ;;  %v57_v7 = vunpack.c.l.s4 %v312_v6  ;;  %v313_v23 = vmov 0.0   ;;  %s314_s23 = smov [#allocation5]  }
  0x10   :  { %vm199_vm9 = vcmask 261120   ;;  %vm201_vm10 = vcmask 523264   ;;  %vm203_vm11 = vcmask 785408   ;;  %s228_s24 = sshll.u32 %s314_s23, 4  ;;  %s229_s24 = int_to_ptr.vmem [resolvable:$true] %s228_s24 }
  0x11   :  { %v41_v4 = vunpack.c.0.s8 %v40_v2  ;;  %v58_v12 = vunpack.c.0.s8 %v57_v7  ;;  %s283_s25 = scalar_lea.vmem %s229_s24, 64  ;;  %p288_p6 = scmp.lt.s32.totalorder %s229_s24, %s229_s24 }
  0x12   :  { %32 = vrot.lane.b32.xlu0 %v27_v0, %s310_s19  ;;  %p284_p5 = scmp.ne.s32.totalorder %s229_s24, %s283_s25  ;;  %p289_p7 = scmp.lt.s32.totalorder %s283_s25, %s283_s25 }
  0x13   :  { %v341_v10 = vsub.s32 %v41_v4, %v43_v5  ;;  %v344_v16 = vsub.s32 %v58_v12, %v43_v5 }
  0x14   :  { %p290_p8 = por %p289_p7, %p288_p6 }
  0x16   :  { %p291_p9 = pnand %p290_p8, %p284_p5 }
  0x80   :  { %v36_v8 = vpop.permute.xlu1 %35  ;;  %v30_v9 = vpop.permute.xlu0 %29 }
  0x81   :  { %v46_v11 = vcombine.low %v30_v9, %v36_v8 }
  0x83   :  { %v53_v15 = vrot.slane %v46_v11, %v341_v10 }
  0x84   :  { %v33_v13 = vpop.permute.xlu0 %32 }
  0x85   :  { %v38_v14 = vcombine.low %v27_v0, %v33_v13 }
  0x87   :  { %v45_v17 = vrot.slane %v38_v14, %v341_v10 }
  0x89   :  { %v54_v18 = vcombine.low %v45_v17, %v53_v15  ;;  %v55_v19 = vcombine.high %v45_v17, %v53_v15 }
  0x8b   :  { %v69_v20 = vrot.slane %v55_v19, %v344_v16  ;;  %v62_v21 = vrot.slane %v54_v18, %v344_v16 }
  0x8d   :  { %v73_v22 = vsel %vm72_vm0, %v62_v21, 0.0  ;;  %v70_v24 = vcombine.high %v62_v21, %v313_v23  ;;  %v71_v25 = vcombine.high %v69_v20, %v313_v23  ;;  %v79_v28 = vsel %vm72_vm0, %v69_v20, 0.0 }
  0x8e   :  { %74 = vadd.xlane.f32.xlu1 %v73_v22 }
  0x8f   :  { %v76_v26 = vsel %vm72_vm0, %v70_v24, 0.0  ;;  %v82_v27 = vsel %vm72_vm0, %v71_v25, 0.0 }
  0x90   :  { %77 = vadd.xlane.f32.xlu0 %v76_v26 }
  0x92   :  { %83 = vadd.xlane.f32.xlu1 %v82_v27 }
  0x94   :  { %80 = vadd.xlane.f32.xlu0 %v79_v28 }
 0x117   :  { %v75_v29 = vpop.xlane.xlu1 %74 }
 0x118   :  { %v85_v30 = vmul.f32 0.03125, %v75_v29 }
 0x119   :  { %v78_v31 = vpop.xlane.xlu0 %77 }
 0x11a   :  { %v355_v32 = vsub.f32 %v62_v21, %v85_v30  ;;  %v86_v33 = vmul.f32 0.03125, %v78_v31 }
 0x11b   :  { %v84_v34 = vpop.xlane.xlu1 %83 }
 0x11c   :  { %v357_v35 = vsub.f32 %v70_v24, %v86_v33  ;;  %v88_v36 = vmul.f32 0.03125, %v84_v34  ;;  %v93_v37 = vmul.f32 %v355_v32, %v355_v32 }
 0x11d   :  { %v81_v38 = vpop.xlane.xlu0 %80 }
 0x11e   :  { %v361_v39 = vsub.f32 %v71_v25, %v88_v36  ;;  %v87_v40 = vmul.f32 0.03125, %v81_v38  ;;  %v97_v41 = vsel %vm72_vm0, %v93_v37, 0.0  ;;  %v94_v42 = vmul.f32 %v357_v35, %v357_v35 }
 0x11f   :  { %98 = vadd.xlane.f32.xlu0 %v97_v41 }
 0x120   :  { %v366_v43 = vsub.f32 %v69_v20, %v87_v40  ;;  %v100_v44 = vsel %vm72_vm0, %v94_v42, 0.0  ;;  %v96_v45 = vmul.f32 %v361_v39, %v361_v39 }
 0x121   :  { %101 = vadd.xlane.f32.xlu1 %v100_v44 }
 0x122   :  { %v95_v46 = vmul.f32 %v366_v43, %v366_v43  ;;  %v106_v47 = vsel %vm72_vm0, %v96_v45, 0.0 }
 0x124   :  { %v103_v48 = vsel %vm72_vm0, %v95_v46, 0.0 }
 0x125   :  { %107 = vadd.xlane.f32.xlu1 %v106_v47  ;;  %104 = vadd.xlane.f32.xlu0 %v103_v48 }
 0x1a8   :  { %v99_v49 = vpop.xlane.xlu0 %98 }
 0x1a9   :  { %v109_v50 = vmul.f32 0.032258064, %v99_v49 }
 0x1aa   :  { %v102_v51 = vpop.xlane.xlu1 %101 }
 0x1ab   :  { %247 = vrsqrt.f32 %v109_v50  ;;  %v110_v52 = vmul.f32 0.032258064, %v102_v51  ;;  %vm115_vm1 = vcmp.eq.f32.partialorder %v109_v50, inf  ;;  %v118_v61 = vand.u32 2147483648, %v109_v50 }
 0x1ac   :  { %vm117_vm2 = vcmp.eq.f32.partialorder %v109_v50, 0.0 }
 0x1ad   :  { %249 = vrsqrt.f32 %v110_v52  ;;  %vm122_vm3 = vcmp.eq.f32.partialorder %v110_v52, inf  ;;  %v125_v0 = vand.u32 2147483648, %v110_v52  ;;  %vm124_vm4 = vcmp.eq.f32.partialorder %v110_v52, 0.0 }
 0x1ae   :  { %v108_v53 = vpop.xlane.xlu1 %107  ;;  %v105_v54 = vpop.xlane.xlu0 %104 }
 0x1af   :  { %v112_v55 = vmul.f32 0.032258064, %v108_v53  ;;  %v111_v56 = vmul.f32 0.032258064, %v105_v54 }
 0x1b1   :  { %251 = vrsqrt.f32 %v112_v55  ;;  %vm136_vm5 = vcmp.eq.f32.partialorder %v112_v55, inf  ;;  %v139_v8 = vand.u32 2147483648, %v112_v55  ;;  %vm138_vm6 = vcmp.eq.f32.partialorder %v112_v55, 0.0 }
 0x1b2   :  { %253 = vrsqrt.f32 %v111_v56  ;;  %vm129_vm7 = vcmp.eq.f32.partialorder %v111_v56, inf  ;;  %v132_v12 = vand.u32 2147483648, %v111_v56  ;;  %vm131_vm8 = vcmp.eq.f32.partialorder %v111_v56, 0.0 }
 0x1b8   :  { %v248_v57 = vpop.eup %247 }
 0x1b9   :  { %v114_v58 = vmul.f32 %v248_v57, %v109_v50 }
 0x1ba   :  { %v250_v59 = vpop.eup %249 }
 0x1bb   :  { %v116_v60 = vsel %vm115_vm1, %v109_v50, %v114_v58  ;;  %v121_v62 = vmul.f32 %v250_v59, %v110_v52 }
 0x1bc   :  { %v119_v63 = vsel %vm117_vm2, %v118_v61, %v116_v60 }
 0x1bd   :  { %v123_v2 = vsel %vm122_vm3, %v110_v52, %v121_v62  ;;  %v141_v6 = vadd.f32 1e-06, %v119_v63 }
 0x1be   :  { %v252_v1 = vpop.eup %251  ;;  %v126_v4 = vsel %vm124_vm4, %v125_v0, %v123_v2 }
 0x1bf   :  { %v254_v3 = vpop.eup %253  ;;  %v135_v5 = vmul.f32 %v252_v1, %v112_v55  ;;  %v142_v7 = vadd.f32 1e-06, %v126_v4 }
 0x1c0   :  { %v128_v9 = vmul.f32 %v254_v3, %v111_v56 }
 0x1c1   :  { %v137_v11 = vsel %vm136_vm5, %v112_v55, %v135_v5  ;;  %255 = vrcp.f32 %v142_v7 }
 0x1c2   :  { %v140_v13 = vsel %vm138_vm6, %v139_v8, %v137_v11  ;;  %v130_v14 = vsel %vm129_vm7, %v111_v56, %v128_v9  ;;  %257 = vrcp.f32 %v141_v6 }
 0x1c3   :  { %v144_v15 = vadd.f32 1e-06, %v140_v13  ;;  %v133_v17 = vsel %vm131_vm8, %v132_v12, %v130_v14 }
 0x1c4   :  { %v143_v18 = vadd.f32 1e-06, %v133_v17 }
 0x1c5   :  { %259 = vrcp.f32 %v144_v15 }
 0x1c6   :  { %261 = vrcp.f32 %v143_v18 }
 0x1ce   :  { %v256_v19 = vpop.eup %255 }
 0x1cf   :  { %v258_v20 = vpop.eup %257  ;;  %v150_v24 = vmul.f32 %v256_v19, %v357_v35 }
 0x1d0   :  { %v149_v26 = vmul.f32 %v258_v20, %v355_v32 }
 0x1d2   :  { %v260_v21 = vpop.eup %259 }
 0x1d3   :  { %v262_v22 = vpop.eup %261  ;;  %v152_v25 = vmul.f32 %v260_v21, %v361_v39 }
 0x1d4   :  { %v151_v27 = vmul.f32 %v262_v22, %v366_v43  ;;  %v238_v43 = vld [vmem:[%s399_s2] ss:$0 sm:$0xff] }
 0x1d5   :  { %v161_v28 = vcombine.low %v150_v24, %v152_v25 }
 0x1d6   :  { %v153_v29 = vcombine.low %v149_v26, %v151_v27 }
 0x1d7   :  { %v168_v30 = vrot.slane %v161_v28, %v341_v10 }
 0x1d8   :  { %v160_v31 = vrot.slane %v153_v29, %v341_v10 }
 0x1da   :  { %v170_v33 = vcombine.high %v160_v31, %v168_v30  ;;  %v169_v34 = vcombine.low %v160_v31, %v168_v30 }
 0x1dc   :  { %v184_v36 = vrot.slane %v170_v33, %v344_v16  ;;  %v177_v37 = vrot.slane %v169_v34, %v344_v16  ;;  %v237_v16 = vld [vmem:[%s398_s1] ss:$0 sm:$0xff] }
 0x1de   :  { %192 = vrot.lane.b32.xlu1 %v184_v36, %s310_s19  ;;  %v185_v35 = vcombine.high %v177_v37, %v313_v23  ;;  %v186_v32 = vcombine.high %v184_v36, %v313_v23 }
 0x1e0   :  { %188 = vrot.lane.b32.xlu0 %v185_v35, %s308_s17 }
 0x1e2   :  { %196 = vrot.lane.b32.xlu1 %v186_v32, %s309_s18 }
 0x250   :  { %v193_v38 = vpop.permute.xlu1 %192 }
 0x252   :  { %v189_v10 = vpop.permute.xlu0 %188 }
 0x253   :  { %v200_v39 = vsel %vm199_vm9, %v177_v37, %v189_v10 }
 0x254   :  { %v197_v40 = vpop.permute.xlu1 %196  ;;  %v202_v41 = vsel %vm201_vm10, %v200_v39, %v193_v38 }
 0x255   :  { %v204_v42 = vsel %vm203_vm11, %v202_v41, %v197_v40 }
 0x256   :  { %v212_v23 = vmul.f32 %v237_v16, %v204_v42 }
 0x258   :  { %v220_v44 = vadd.f32 %v238_v43, %v212_v23 }
 0x25a   :  { %221 = vst [vmem:[#allocation5] sm:$0xf] %v220_v44 }
 0x25b   :  { %294 = shalt.err (!%p291_p9)
}
 0x25c   :  { %231 = dma.vmem_to_hbm [thread:$0]  %s229_s24, 64, %s400_s3, [#allocation4]  }
 0x25d   :  { %305 = dma.done.wait [#allocation4], 64  }
 0x25e   :  { %306 = vsyncadd [#allocation4], 4294967232 }
 0x25f   :  { %235 = vsyncpa [#allocation3], 1 }
 0x260   :  { %236 = vsyncpa [#allocation4], 1 }

</bundles_post_ra>
